<compile_context>
chip_gen: v7x
topology: tpu7x:2x2x1
jax: 0.10.0
libtpu: 0.0.40
codegen_flags: <defaults>
</compile_context>

<pallas_src>
import jax
import jax.numpy as jnp
from jax.experimental import pallas as pl
from jax.experimental.pallas import tpu as pltpu

_EPS = 1e-5


def _round_up(x, m):
    return ((x + m - 1) // m) * m


def _vmem_cap_bytes():
    try:
        return int(pltpu.get_tpu_info().vmem_capacity_bytes)
    except Exception:
        return 64 << 20  # conservative: v7x per-TensorCore VMEM


def _compiler_params(dim_sem, est_bytes):
    cap = _vmem_cap_bytes()
    limit = int(min(int(0.85 * cap), max(32 << 20, int(1.5 * est_bytes))))
    return pltpu.CompilerParams(dimension_semantics=dim_sem,
                                vmem_limit_bytes=limit)


def _instance_norm(y):
    # Per-channel normalization over the spatial (lane) axis, biased variance,
    # no affine (nn.InstanceNormNd defaults).  Single-pass variance with a
    # clamp to guard against E[y^2]-E[y]^2 cancellation.
    mu = jnp.mean(y, axis=-1, keepdims=True)
    var = jnp.maximum(jnp.mean(y * y, axis=-1, keepdims=True) - mu * mu, 0.0)
    return (y - mu) * jax.lax.rsqrt(var + _EPS)


# ----------------------------------------------------------------------------
# Fused path: one grid step per sample, whole (1, C, S) blocks resident.
# ----------------------------------------------------------------------------
def _attention_fused_kernel(g_ref, x_ref, wg_ref, wx_ref, wp_ref, out_ref):
    g = g_ref[0]                                   # (f_g, S) compute dtype
    x = x_ref[0]                                   # (f_l, S)
    g1 = _instance_norm(
        jnp.dot(wg_ref[...], g, preferred_element_type=jnp.float32))
    x1 = _instance_norm(
        jnp.dot(wx_ref[...], x, preferred_element_type=jnp.float32))
    a = jnp.maximum(g1 + x1, 0.0)                  # (f_int, S) f32
    # psi 1x1 conv (single output channel) as a VPU/XLU weighted channel sum.
    p_pre = jnp.sum(a * wp_ref[...], axis=0, keepdims=True)        # (1, S)
    p = jax.nn.sigmoid(_instance_norm(p_pre))                      # (1, S) f32
    # Gate the skip connection; multiply in the activation dtype (no f32
    # round-trip of x), lane-dense store.
    out_ref[0, :, :] = (x * p.astype(x.dtype)).astype(out_ref.dtype)


def _attention_block_fused(g_ncs, x_ncs, wg, wx, wp, out_dtype):
    N, f_g, S = g_ncs.shape
    _, f_l, _ = x_ncs.shape
    f_int = wg.shape[0]
    ab = jnp.dtype(g_ncs.dtype).itemsize
    ob = jnp.dtype(out_dtype).itemsize
    est = (2 * S * (f_g * ab + f_l * ab + f_l * ob)
           + 4 * S * (3 * f_int + 4) + (2 << 20))
    return pl.pallas_call(
        _attention_fused_kernel,
        out_shape=jax.ShapeDtypeStruct((N, f_l, S), out_dtype),
        grid_spec=pltpu.PrefetchScalarGridSpec(
            num_scalar_prefetch=0,
            grid=(N,),
            in_specs=[
                pl.BlockSpec((1, f_g, S), lambda n: (n, 0, 0)),    # g
                pl.BlockSpec((1, f_l, S), lambda n: (n, 0, 0)),    # x
                pl.BlockSpec((f_int, f_g), lambda n: (0, 0)),      # wg
                pl.BlockSpec((f_int, f_l), lambda n: (0, 0)),      # wx
                pl.BlockSpec((f_int, 1), lambda n: (0, 0)),        # wp
            ],
            out_specs=pl.BlockSpec((1, f_l, S), lambda n: (n, 0, 0)),
        ),
        compiler_params=_compiler_params(("parallel",), est),
    )(g_ncs, x_ncs, wg, wx, wp)


# ----------------------------------------------------------------------------
# Tiled path: S tiled (multiple of 128), three passes.
#   pass 1: accumulate per-channel sum / sum-of-squares of the conv outputs
#   pass 2: normalize -> relu -> psi 1x1 conv (pre-norm), per S tile
#   pass 3: psi InstanceNorm -> sigmoid -> gate, per S tile
# ----------------------------------------------------------------------------
def _stats_kernel(g_ref, x_ref, wg_ref, wx_ref,
                  sg_ref, sqg_ref, sx_ref, sqx_ref):
    s = pl.program_id(1)

    @pl.when(s == 0)
    def _():
        sg_ref[...] = jnp.zeros_like(sg_ref)
        sqg_ref[...] = jnp.zeros_like(sqg_ref)
        sx_ref[...] = jnp.zeros_like(sx_ref)
        sqx_ref[...] = jnp.zeros_like(sqx_ref)

    cg = jnp.dot(wg_ref[...], g_ref[0], preferred_element_type=jnp.float32)
    cx = jnp.dot(wx_ref[...], x_ref[0], preferred_element_type=jnp.float32)
    sg_ref[0] += jnp.sum(cg, axis=-1, keepdims=True)
    sqg_ref[0] += jnp.sum(cg * cg, axis=-1, keepdims=True)
    sx_ref[0] += jnp.sum(cx, axis=-1, keepdims=True)
    sqx_ref[0] += jnp.sum(cx * cx, axis=-1, keepdims=True)


def _psi_pre_kernel(g_ref, x_ref, wg_ref, wx_ref, wp_ref,
                    mug_ref, ivg_ref, mux_ref, ivx_ref, ppre_ref):
    cg = jnp.dot(wg_ref[...], g_ref[0], preferred_element_type=jnp.float32)
    cx = jnp.dot(wx_ref[...], x_ref[0], preferred_element_type=jnp.float32)
    g1 = (cg - mug_ref[0]) * ivg_ref[0]            # (f_int, ts) f32
    x1 = (cx - mux_ref[0]) * ivx_ref[0]
    a = jnp.maximum(g1 + x1, 0.0)
    ppre_ref[0] = jnp.sum(a * wp_ref[...], axis=0, keepdims=True)  # (1, ts)


def _gate_kernel(x_ref, ppre_ref, mup_ref, ivp_ref, out_ref):
    x = x_ref[0]                                   # (f_l, ts) compute dtype
    p = jax.nn.sigmoid((ppre_ref[0] - mup_ref[0]) * ivp_ref[0])    # (1, ts) f32
    out_ref[0] = (x * p.astype(x.dtype)).astype(out_ref.dtype)


def _attention_block_tiled(g_ncs, x_ncs, wg, wx, wp, out_dtype, tile_s):
    N, f_g, S = g_ncs.shape
    _, f_l, _ = x_ncs.shape
    f_int = wg.shape[0]
    ab = jnp.dtype(g_ncs.dtype).itemsize
    ob = jnp.dtype(out_dtype).itemsize

    tile_s = max(128, _round_up(min(tile_s, _round_up(S, 128)), 128))
    S_pad = _round_up(S, tile_s)
    n_t = S_pad // tile_s
    if S_pad != S:
        # Zero pads contribute nothing to the conv-output stats (no bias), and
        # pad lanes are excluded from the psi stats + sliced off at the end.
        pad = [(0, 0), (0, 0), (0, S_pad - S)]
        g_ncs = jnp.pad(g_ncs, pad)
        x_ncs = jnp.pad(x_ncs, pad)

    # ---- pass 1: per-channel sum / sum-of-squares accumulators --------------
    stat_shape = jax.ShapeDtypeStruct((N, f_int, 1), jnp.float32)
    stat_spec = pl.BlockSpec((1, f_int, 1), lambda n, s: (n, 0, 0))
    est1 = 2 * tile_s * (f_g + f_l) * ab + 8 * tile_s * f_int + (2 << 20)
    sg, sqg, sx, sqx = pl.pallas_call(
        _stats_kernel,
        out_shape=(stat_shape, stat_shape, stat_shape, stat_shape),
        grid_spec=pltpu.PrefetchScalarGridSpec(
            num_scalar_prefetch=0,
            grid=(N, n_t),
            in_specs=[
                pl.BlockSpec((1, f_g, tile_s), lambda n, s: (n, 0, s)),
                pl.BlockSpec((1, f_l, tile_s), lambda n, s: (n, 0, s)),
                pl.BlockSpec((f_int, f_g), lambda n, s: (0, 0)),
                pl.BlockSpec((f_int, f_l), lambda n, s: (0, 0)),
            ],
            out_specs=(stat_spec, stat_spec, stat_spec, stat_spec),
        ),
        compiler_params=_compiler_params(("parallel", "arbitrary"), est1),
    )(g_ncs, x_ncs, wg, wx)

    inv_s = 1.0 / float(S)                         # divide by TRUE spatial size
    mu_g = sg * inv_s
    var_g = jnp.maximum(sqg * inv_s - mu_g * mu_g, 0.0)
    inv_g = jax.lax.rsqrt(var_g + _EPS)
    mu_x = sx * inv_s
    var_x = jnp.maximum(sqx * inv_s - mu_x * mu_x, 0.0)
    inv_x = jax.lax.rsqrt(var_x + _EPS)

    # ---- pass 2: normalize -> relu -> psi pre-activation --------------------
    est2 = (2 * tile_s * ((f_g + f_l) * ab + 4)
            + 4 * tile_s * (3 * f_int + 2) + (2 << 20))
    ppre = pl.pallas_call(
        _psi_pre_kernel,
        out_shape=jax.ShapeDtypeStruct((N, 1, S_pad), jnp.float32),
        grid_spec=pltpu.PrefetchScalarGridSpec(
            num_scalar_prefetch=0,
            grid=(N, n_t),
            in_specs=[
                pl.BlockSpec((1, f_g, tile_s), lambda n, s: (n, 0, s)),
                pl.BlockSpec((1, f_l, tile_s), lambda n, s: (n, 0, s)),
                pl.BlockSpec((f_int, f_g), lambda n, s: (0, 0)),
                pl.BlockSpec((f_int, f_l), lambda n, s: (0, 0)),
                pl.BlockSpec((f_int, 1), lambda n, s: (0, 0)),
                pl.BlockSpec((1, f_int, 1), lambda n, s: (n, 0, 0)),
                pl.BlockSpec((1, f_int, 1), lambda n, s: (n, 0, 0)),
                pl.BlockSpec((1, f_int, 1), lambda n, s: (n, 0, 0)),
                pl.BlockSpec((1, f_int, 1), lambda n, s: (n, 0, 0)),
            ],
            out_specs=pl.BlockSpec((1, 1, tile_s), lambda n, s: (n, 0, s)),
        ),
        compiler_params=_compiler_params(("parallel", "parallel"), est2),
    )(g_ncs, x_ncs, wg, wx, wp, mu_g, inv_g, mu_x, inv_x)

    # psi-branch InstanceNorm stats over the TRUE spatial extent (tiny, 1 chan)
    pv = ppre[:, :, :S]
    mu_p = jnp.mean(pv, axis=-1, keepdims=True)
    var_p = jnp.maximum(jnp.mean(pv * pv, axis=-1, keepdims=True) - mu_p * mu_p, 0.0)
    inv_p = jax.lax.rsqrt(var_p + _EPS)

    # ---- pass 3: psi norm -> sigmoid -> gate the skip connection ------------
    est3 = 2 * tile_s * (f_l * ab + 4 + f_l * ob) + 8 * tile_s + (2 << 20)
    out = pl.pallas_call(
        _gate_kernel,
        out_shape=jax.ShapeDtypeStruct((N, f_l, S_pad), out_dtype),
        grid_spec=pltpu.PrefetchScalarGridSpec(
            num_scalar_prefetch=0,
            grid=(N, n_t),
            in_specs=[
                pl.BlockSpec((1, f_l, tile_s), lambda n, s: (n, 0, s)),
                pl.BlockSpec((1, 1, tile_s), lambda n, s: (n, 0, s)),
                pl.BlockSpec((1, 1, 1), lambda n, s: (n, 0, 0)),
                pl.BlockSpec((1, 1, 1), lambda n, s: (n, 0, 0)),
            ],
            out_specs=pl.BlockSpec((1, f_l, tile_s), lambda n, s: (n, 0, s)),
        ),
        compiler_params=_compiler_params(("parallel", "parallel"), est3),
    )(x_ncs, ppre, mu_p, inv_p)
    return out[:, :, :S]


# ----------------------------------------------------------------------------
# Public wrapper
# ----------------------------------------------------------------------------
def attention_block(g_nchw, x_nchw, params, *,
                    compute_dtype=jnp.bfloat16,
                    out_dtype=None,
                    tile_s=4096,
                    force_tiled=False):
    """g_nchw: (N, f_g, H, W), x_nchw: (N, f_l, H, W)  -> (N, f_l, H, W)."""
    N, f_g, H, W = g_nchw.shape
    _, f_l, _, _ = x_nchw.shape
    f_int = params["wg"].shape[0]
    S = H * W
    out_dtype = x_nchw.dtype if out_dtype is None else out_dtype

    # NCHW flattened over (H, W) is already channel-major: pure reshape only.
    # bf16 at the HBM/MXU boundary; f32 accumulation + f32 elementwise inside.
    g_ncs = g_nchw.reshape(N, f_g, S).astype(compute_dtype)
    x_ncs = x_nchw.reshape(N, f_l, S).astype(compute_dtype)
    wg = params["wg"].astype(compute_dtype)          # (f_int, f_g) = (Cout, Cin)
    wx = params["wx"].astype(compute_dtype)          # (f_int, f_l)
    wp = params["wp"].reshape(f_int, 1).astype(jnp.float32)   # VPU column, f32
    # Biases bg/bx/bp intentionally NOT passed: cancelled by affine-free
    # InstanceNorm immediately after each conv.

    ab = jnp.dtype(compute_dtype).itemsize
    ob = jnp.dtype(out_dtype).itemsize
    fused_est = (2 * S * (f_g * ab + f_l * ab + f_l * ob)
                 + 4 * S * (3 * f_int + 4) + (2 << 20))
    budget = int(0.6 * _vmem_cap_bytes())

    if force_tiled or fused_est > budget:
        out_ncs = _attention_block_tiled(g_ncs, x_ncs, wg, wx, wp, out_dtype, tile_s)
    else:
        out_ncs = _attention_block_fused(g_ncs, x_ncs, wg, wx, wp, out_dtype)

    return out_ncs.reshape(N, f_l, H, W)


def attention_block_ref(g_nchw, x_nchw, params, eps=_EPS):
    """Pure-JAX reference (same math as the PyTorch module, NCHW, WITH biases)."""
    def conv1x1(y, w, b):  # y: (N,Cin,H,W), w: (Cout,Cin)
        out = jnp.einsum("nchw,dc->ndhw", y.astype(jnp.float32), w,
                         precision=jax.lax.Precision.HIGHEST)
        return out + b[None, :, None, None]

    def inorm(y):
        mu = jnp.mean(y, axis=(2, 3), keepdims=True)
        var = jnp.mean((y - mu) ** 2, axis=(2, 3), keepdims=True)
        return (y - mu) / jnp.sqrt(var + eps)

    g1 = inorm(conv1x1(g_nchw, params["wg"], params["bg"]))
    x1 = inorm(conv1x1(x_nchw, params["wx"], params["bx"]))
    a = jnp.maximum(g1 + x1, 0.0)
    p = jax.nn.sigmoid(inorm(conv1x1(a, params["wp"].reshape(1, -1), params["bp"])))
    return (x_nchw.astype(jnp.float32) * p).astype(x_nchw.dtype)


if __name__ == "__main__":
    # Shapes implied by AttentionLayer: spatial_dims=2, f_g = f_l = in_channels,
    # f_int = in_channels // 2.  Small demo: batch=2, in_channels=8, 16x16.
    N, in_channels, H, W = 2, 8, 16, 16
    f_g = f_l = in_channels
    f_int = in_channels // 2

    key = jax.random.PRNGKey(0)
    kg, kx, k1, k2, k3, k4, k5, k6 = jax.random.split(key, 8)

    g = jax.random.normal(kg, (N, f_g, H, W), dtype=jnp.float32)
    x = jax.random.normal(kx, (N, f_l, H, W), dtype=jnp.float32)

    params = {
        "wg": 0.2 * jax.random.normal(k1, (f_int, f_g), dtype=jnp.float32),
        "bg": 0.1 * jax.random.normal(k2, (f_int,), dtype=jnp.float32),
        "wx": 0.2 * jax.random.normal(k3, (f_int, f_l), dtype=jnp.float32),
        "bx": 0.1 * jax.random.normal(k4, (f_int,), dtype=jnp.float32),
        "wp": 0.2 * jax.random.normal(k5, (1, f_int), dtype=jnp.float32),
        "bp": 0.1 * jax.random.normal(k6, (1,), dtype=jnp.float32),
    }

    ref_f32 = attention_block_ref(g, x, params)

    def rb(a):  # what the kernel sees at its bf16 HBM boundary
        return a.astype(jnp.bfloat16).astype(jnp.float32)

    params_q = dict(params, wg=rb(params["wg"]), wx=rb(params["wx"]))
    ref_bf16 = attention_block_ref(rb(g), rb(x), params_q)

    # 1) f32 end-to-end, fused whole-sample path.
    out = jax.block_until_ready(
        attention_block(g, x, params, compute_dtype=jnp.float32))
    assert out.shape == (N, f_l, H, W)
    assert jnp.allclose(out, ref_f32, atol=2e-3, rtol=2e-3), "fused f32 mismatch"

    # 2) f32 end-to-end, S-tiled three-pass path (production-shape structure).
    out = jax.block_until_ready(
        attention_block(g, x, params, compute_dtype=jnp.float32,
                        force_tiled=True, tile_s=128))
    assert jnp.allclose(out, ref_f32, atol=2e-3, rtol=2e-3), "tiled f32 mismatch"

    # 3) bf16 HBM/MXU boundary (default), fused path.
    out = jax.block_until_ready(attention_block(g, x, params))
    assert bool(jnp.all(jnp.isfinite(out)))
    assert jnp.allclose(out, ref_bf16, atol=5e-2, rtol=5e-2), "fused bf16 mismatch"

    # 4) bf16 boundary, tiled path.
    out = jax.block_until_ready(
        attention_block(g, x, params, force_tiled=True, tile_s=128))
    assert jnp.allclose(out, ref_bf16, atol=5e-2, rtol=5e-2), "tiled bf16 mismatch"

    print("KERNEL_OK")
</pallas_src>

<mosaic_0001>
module attributes {stable_mosaic.version = 11 : i64} {
  func.func @_attention_fused_kernel(%arg0: i32, %arg1: memref<1x8x256xf32, #tpu.memory_space<vmem>>, %arg2: memref<1x8x256xf32, #tpu.memory_space<vmem>>, %arg3: memref<4x8xf32, #tpu.memory_space<vmem>>, %arg4: memref<4x8xf32, #tpu.memory_space<vmem>>, %arg5: memref<4x1xf32, #tpu.memory_space<vmem>>, %arg6: memref<1x8x256xf32, #tpu.memory_space<vmem>>) attributes {dimension_semantics = [#tpu.dimension_semantics<parallel>], iteration_bounds = array<i64: 2>, scalar_prefetch = 0 : i64, scratch_operands = 0 : i64, tpu.core_type = #tpu.core_type<tc>, window_params = [{transform_indices = @transform_0, window_bounds = array<i64: 1, 8, 256>}, {transform_indices = @transform_1, window_bounds = array<i64: 1, 8, 256>}, {pipeline_mode = #tpu.pipeline_mode<synchronous>, transform_indices = @transform_2, window_bounds = array<i64: 4, 8>}, {pipeline_mode = #tpu.pipeline_mode<synchronous>, transform_indices = @transform_3, window_bounds = array<i64: 4, 8>}, {pipeline_mode = #tpu.pipeline_mode<synchronous>, transform_indices = @transform_4, window_bounds = array<i64: 4, 1>}, {transform_indices = @transform_5, window_bounds = array<i64: 1, 8, 256>}]} {
    %c0 = arith.constant 0 : index
    %c0_0 = arith.constant 0 : index
    %c0_1 = arith.constant 0 : index
    %0 = vector.load %arg1[%c0, %c0_0, %c0_1] : memref<1x8x256xf32, #tpu.memory_space<vmem>>, vector<1x8x256xf32>
    %1 = vector.shape_cast %0 : vector<1x8x256xf32> to vector<8x256xf32>
    %c0_2 = arith.constant 0 : index
    %c0_3 = arith.constant 0 : index
    %c0_4 = arith.constant 0 : index
    %2 = vector.load %arg2[%c0_2, %c0_3, %c0_4] : memref<1x8x256xf32, #tpu.memory_space<vmem>>, vector<1x8x256xf32>
    %3 = vector.shape_cast %2 : vector<1x8x256xf32> to vector<8x256xf32>
    %c0_5 = arith.constant 0 : index
    %c0_6 = arith.constant 0 : index
    %4 = vector.load %arg3[%c0_5, %c0_6] : memref<4x8xf32, #tpu.memory_space<vmem>>, vector<4x8xf32>
    %cst = arith.constant dense<0.000000e+00> : vector<4x256xf32>
    %5 = tpu.matmul %4, %1, %cst {dimension_numbers = #tpu.dot_dimension_numbers<[1], [0], [0], [1], [0, 0, 1, 1], [], []>} : vector<4x8xf32>, vector<8x256xf32>, vector<4x256xf32> -> vector<4x256xf32>
    %cst_7 = arith.constant dense<0.000000e+00> : vector<4xf32>
    %6 = vector.multi_reduction <add>, %5, %cst_7 [1] : vector<4x256xf32> to vector<4xf32>
    %7 = vector.shape_cast %6 : vector<4xf32> to vector<4x1xf32>
    %cst_8 = arith.constant 2.560000e+02 : f32
    %8 = vector.broadcast %cst_8 : f32 to vector<4x1xf32>
    %9 = arith.divf %7, %8 : vector<4x1xf32>
    %10 = arith.mulf %5, %5 : vector<4x256xf32>
    %cst_9 = arith.constant dense<0.000000e+00> : vector<4xf32>
    %11 = vector.multi_reduction <add>, %10, %cst_9 [1] : vector<4x256xf32> to vector<4xf32>
    %12 = vector.shape_cast %11 : vector<4xf32> to vector<4x1xf32>
    %cst_10 = arith.constant 2.560000e+02 : f32
    %13 = vector.broadcast %cst_10 : f32 to vector<4x1xf32>
    %14 = arith.divf %12, %13 : vector<4x1xf32>
    %15 = arith.mulf %9, %9 : vector<4x1xf32>
    %16 = arith.subf %14, %15 : vector<4x1xf32>
    %cst_11 = arith.constant 0.000000e+00 : f32
    %17 = vector.broadcast %cst_11 : f32 to vector<4x1xf32>
    %18 = arith.maximumf %16, %17 : vector<4x1xf32>
    %19 = vector.broadcast %9 : vector<4x1xf32> to vector<4x256xf32>
    %20 = arith.subf %5, %19 : vector<4x256xf32>
    %cst_12 = arith.constant 9.99999974E-6 : f32
    %21 = vector.broadcast %cst_12 : f32 to vector<4x1xf32>
    %22 = arith.addf %18, %21 : vector<4x1xf32>
    %23 = math.rsqrt %22 : vector<4x1xf32>
    %24 = vector.broadcast %23 : vector<4x1xf32> to vector<4x256xf32>
    %25 = arith.mulf %20, %24 : vector<4x256xf32>
    %c0_13 = arith.constant 0 : index
    %c0_14 = arith.constant 0 : index
    %26 = vector.load %arg4[%c0_13, %c0_14] : memref<4x8xf32, #tpu.memory_space<vmem>>, vector<4x8xf32>
    %cst_15 = arith.constant dense<0.000000e+00> : vector<4x256xf32>
    %27 = tpu.matmul %26, %3, %cst_15 {dimension_numbers = #tpu.dot_dimension_numbers<[1], [0], [0], [1], [0, 0, 1, 1], [], []>} : vector<4x8xf32>, vector<8x256xf32>, vector<4x256xf32> -> vector<4x256xf32>
    %cst_16 = arith.constant dense<0.000000e+00> : vector<4xf32>
    %28 = vector.multi_reduction <add>, %27, %cst_16 [1] : vector<4x256xf32> to vector<4xf32>
    %29 = vector.shape_cast %28 : vector<4xf32> to vector<4x1xf32>
    %cst_17 = arith.constant 2.560000e+02 : f32
    %30 = vector.broadcast %cst_17 : f32 to vector<4x1xf32>
    %31 = arith.divf %29, %30 : vector<4x1xf32>
    %32 = arith.mulf %27, %27 : vector<4x256xf32>
    %cst_18 = arith.constant dense<0.000000e+00> : vector<4xf32>
    %33 = vector.multi_reduction <add>, %32, %cst_18 [1] : vector<4x256xf32> to vector<4xf32>
    %34 = vector.shape_cast %33 : vector<4xf32> to vector<4x1xf32>
    %cst_19 = arith.constant 2.560000e+02 : f32
    %35 = vector.broadcast %cst_19 : f32 to vector<4x1xf32>
    %36 = arith.divf %34, %35 : vector<4x1xf32>
    %37 = arith.mulf %31, %31 : vector<4x1xf32>
    %38 = arith.subf %36, %37 : vector<4x1xf32>
    %cst_20 = arith.constant 0.000000e+00 : f32
    %39 = vector.broadcast %cst_20 : f32 to vector<4x1xf32>
    %40 = arith.maximumf %38, %39 : vector<4x1xf32>
    %41 = vector.broadcast %31 : vector<4x1xf32> to vector<4x256xf32>
    %42 = arith.subf %27, %41 : vector<4x256xf32>
    %cst_21 = arith.constant 9.99999974E-6 : f32
    %43 = vector.broadcast %cst_21 : f32 to vector<4x1xf32>
    %44 = arith.addf %40, %43 : vector<4x1xf32>
    %45 = math.rsqrt %44 : vector<4x1xf32>
    %46 = vector.broadcast %45 : vector<4x1xf32> to vector<4x256xf32>
    %47 = arith.mulf %42, %46 : vector<4x256xf32>
    %48 = arith.addf %25, %47 : vector<4x256xf32>
    %cst_22 = arith.constant 0.000000e+00 : f32
    %49 = vector.broadcast %cst_22 : f32 to vector<4x256xf32>
    %50 = arith.maximumf %48, %49 : vector<4x256xf32>
    %c0_23 = arith.constant 0 : index
    %c0_24 = arith.constant 0 : index
    %51 = vector.load %arg5[%c0_23, %c0_24] : memref<4x1xf32, #tpu.memory_space<vmem>>, vector<4x1xf32>
    %52 = vector.broadcast %51 : vector<4x1xf32> to vector<4x256xf32>
    %53 = arith.mulf %50, %52 : vector<4x256xf32>
    %cst_25 = arith.constant dense<0.000000e+00> : vector<256xf32>
    %54 = vector.multi_reduction <add>, %53, %cst_25 [0] : vector<4x256xf32> to vector<256xf32>
    %55 = vector.shape_cast %54 : vector<256xf32> to vector<1x256xf32>
    %cst_26 = arith.constant dense<0.000000e+00> : vector<1xf32>
    %56 = vector.multi_reduction <add>, %55, %cst_26 [1] : vector<1x256xf32> to vector<1xf32>
    %57 = vector.shape_cast %56 : vector<1xf32> to vector<1x1xf32>
    %cst_27 = arith.constant 2.560000e+02 : f32
    %58 = vector.broadcast %cst_27 : f32 to vector<1x1xf32>
    %59 = arith.divf %57, %58 : vector<1x1xf32>
    %60 = arith.mulf %55, %55 : vector<1x256xf32>
    %cst_28 = arith.constant dense<0.000000e+00> : vector<1xf32>
    %61 = vector.multi_reduction <add>, %60, %cst_28 [1] : vector<1x256xf32> to vector<1xf32>
    %62 = vector.shape_cast %61 : vector<1xf32> to vector<1x1xf32>
    %cst_29 = arith.constant 2.560000e+02 : f32
    %63 = vector.broadcast %cst_29 : f32 to vector<1x1xf32>
    %64 = arith.divf %62, %63 : vector<1x1xf32>
    %65 = arith.mulf %59, %59 : vector<1x1xf32>
    %66 = arith.subf %64, %65 : vector<1x1xf32>
    %cst_30 = arith.constant 0.000000e+00 : f32
    %67 = vector.broadcast %cst_30 : f32 to vector<1x1xf32>
    %68 = arith.maximumf %66, %67 : vector<1x1xf32>
    %69 = vector.broadcast %59 : vector<1x1xf32> to vector<1x256xf32>
    %70 = arith.subf %55, %69 : vector<1x256xf32>
    %cst_31 = arith.constant 9.99999974E-6 : f32
    %71 = vector.broadcast %cst_31 : f32 to vector<1x1xf32>
    %72 = arith.addf %68, %71 : vector<1x1xf32>
    %73 = math.rsqrt %72 : vector<1x1xf32>
    %74 = vector.broadcast %73 : vector<1x1xf32> to vector<1x256xf32>
    %75 = arith.mulf %70, %74 : vector<1x256xf32>
    %76 = arith.negf %75 : vector<1x256xf32>
    %77 = math.exp %76 : vector<1x256xf32>
    %cst_32 = arith.constant 1.000000e+00 : f32
    %78 = vector.broadcast %cst_32 : f32 to vector<1x256xf32>
    %79 = arith.addf %78, %77 : vector<1x256xf32>
    %80 = arith.divf %78, %79 : vector<1x256xf32>
    %81 = vector.broadcast %80 : vector<1x256xf32> to vector<8x256xf32>
    %82 = arith.mulf %3, %81 : vector<8x256xf32>
    %c0_33 = arith.constant 0 : index
    %c0_34 = arith.constant 0 : index
    %c0_35 = arith.constant 0 : index
    %83 = vector.load %arg6[%c0_33, %c0_34, %c0_35] : memref<1x8x256xf32, #tpu.memory_space<vmem>>, vector<1x8x256xf32>
    %84 = vector.shape_cast %83 : vector<1x8x256xf32> to vector<8x256xf32>
    %85 = vector.shape_cast %82 : vector<8x256xf32> to vector<1x8x256xf32>
    tpu.vector_store %arg6[%c0_33, %c0_34, %c0_35], %85 {strides = array<i32>} : memref<1x8x256xf32, #tpu.memory_space<vmem>>, vector<1x8x256xf32>,
    return
  }
  func.func @transform_0(%arg0: i32) -> (i32, i32, i32) {
    %c0_i32 = arith.constant 0 : i32
    %c0_i32_0 = arith.constant 0 : i32
    %c0_i32_1 = arith.constant 0 : i32
    return %arg0, %c0_i32, %c0_i32_0 : i32, i32, i32
  }
  func.func @transform_1(%arg0: i32) -> (i32, i32, i32) {
    %c0_i32 = arith.constant 0 : i32
    %c0_i32_0 = arith.constant 0 : i32
    %c0_i32_1 = arith.constant 0 : i32
    return %arg0, %c0_i32, %c0_i32_0 : i32, i32, i32
  }
  func.func @transform_2(%arg0: i32) -> (i32, i32) {
    %c0_i32 = arith.constant 0 : i32
    %c0_i32_0 = arith.constant 0 : i32
    %c0_i32_1 = arith.constant 0 : i32
    return %c0_i32, %c0_i32_0 : i32, i32
  }
  func.func @transform_3(%arg0: i32) -> (i32, i32) {
    %c0_i32 = arith.constant 0 : i32
    %c0_i32_0 = arith.constant 0 : i32
    %c0_i32_1 = arith.constant 0 : i32
    return %c0_i32, %c0_i32_0 : i32, i32
  }
  func.func @transform_4(%arg0: i32) -> (i32, i32) {
    %c0_i32 = arith.constant 0 : i32
    %c0_i32_0 = arith.constant 0 : i32
    %c0_i32_1 = arith.constant 0 : i32
    return %c0_i32, %c0_i32_0 : i32, i32
  }
  func.func @transform_5(%arg0: i32) -> (i32, i32, i32) {
    %c0_i32 = arith.constant 0 : i32
    %c0_i32_0 = arith.constant 0 : i32
    %c0_i32_1 = arith.constant 0 : i32
    return %arg0, %c0_i32, %c0_i32_0 : i32, i32, i32
  }
}

</mosaic_0001>

<bundles_post_ra>
// kernel: tpu_custom_call.1
= control target key start
LH: loop header
LB: loop body
LE: loop exit
PB: predicated region body
PF: predicated region fallthrough
CT: control target
= control target key end

     0   :  { %10 = vsyncpa [#allocation3], 0  ;;  %s1152_s0 = inlined_call_operand.hbm [shape: f32[2,8,256], index: 0, kind: input, shape index: {}]   ;;  %s1153_s1 = inlined_call_operand.hbm [shape: f32[2,8,256], index: 1, kind: input, shape index: {}]   ;;  %s1154_s2 = inlined_call_operand.vmem [shape: f32[4,8], index: 2, kind: input, shape index: {}]   ;;  %s1155_s3 = inlined_call_operand.vmem [shape: f32[4,8], index: 3, kind: input, shape index: {}]   ;;  %s1156_s4 = inlined_call_operand.vmem [shape: f32[4,1], index: 4, kind: input, shape index: {}]   ;;  %s1157_s5 = inlined_call_operand.hbm [shape: f32[2,8,256], index: 5, kind: output, shape index: {}]  }
   0x1   :  { %12 = vsyncpa [#allocation3 + $0x1], 0 }
   0x2   :  { %13 = vsyncpa [#allocation6], 0 }
   0x3   :  { %15 = vsyncpa [#allocation6 + $0x1], 0 }
   0x4   :  { %16 = vsyncpa [#allocation4], 0 }
   0x5   :  { %18 = vsyncpa [#allocation4 + $0x1], 0  ;;  %s911_s18 = smov 0   ;;  %s913_s19 = smov 0  }
   0x6   :  { %s915_s20 = smov 0   ;;  %s917_s21 = smov 0  }
   0x7 LB: > { %s932_s22 = sadd.s32 4294967295, %s874_s21   ;;  %s651_s23 = sadd.s32 4294967294, %s874_s21   ;;  %s874_s21 = sphi %s917_s21, %s1176_s21   ;;  %s870_s20 = sphi %s915_s20, %s1175_s20   ;;  %s866_s19 = sphi %s913_s19, %s1174_s19   ;;  %s862_s18 = sphi %s911_s18, %s1173_s18  }
   0x8   : > { %s936_s24 = sadd.s32 1, %s874_s21   ;;  %s31_s25 = sadd.s32 1, %s870_s20 }
   0x9   : > { %s28_s26 = ssub.s32 %s874_s21, %s936_s24  ;;  %p38_p0 = scmp.ne.s32.totalorder %s870_s20, %s866_s19 }
   0xa   : > { %p29_p1 = scmp.eq.s32.totalorder %s28_s26, 0  ;;  %p39_p2 = scmp.eq.s32.totalorder %s874_s21, 0 }
   0xb   : > { %p44_p3 = scmp.ne.s32.totalorder %s866_s19, %s862_s18  ;;  %p45_p4 = scmp.eq.s32.totalorder %s932_s22, 0 }
   0xc   : > { %s948_s27 = scalar_select %p29_p1, %s870_s20, %s31_s25  }
   0xd   : > { %p950_p5 = por %p39_p2, %p38_p0  ;;  %p954_p6 = por %p45_p4, %p44_p3 }
   0xe   : > { %p157_p7 = scmp.eq.s32.totalorder %s932_s22, 1  ;;  %p163_p8 = scmp.eq.s32.totalorder %s651_s23, 1 }
   0xf   : > { %s1161_s29 = scalar_select %p954_p6, 1, 0 }
  0x10   : > { %p693_p10 = scmp.lt.s32.totalorder %s874_s21, 2  ;;  %p961_p11 = por %p157_p7, %p38_p0 }
  0x11   : > { %p965_p12 = por %p163_p8, %p44_p3  ;;  %s970_s7 = sand.u32 1, %s870_s20  }
  0x12   : > { %s1162_s30 = scalar_select %p961_p11, 1, 0 }
  0x13   : > { %s1163_s6 = scalar_select %p965_p12, 1, 0 }
  0x14   : > { %s673_s8 = sshll.u32 %s874_s21, 8  ;;  %s654_s9 = sshll.u32 %s970_s7, 4 }
  0x15   : > { %s979_s12 = scalar_lea.hbm %s1152_s0, %s673_s8  ;;  %s196_s13 = scalar_lea.vmem [#allocation2], %s654_s9 }
  0x16   : > { %s204_s14 = sshll.u32 %s196_s13, 4  ;;  %p985_p13 = pnand %p693_p10, %p950_p5  ;;  %s989_s14 = int_to_ptr.vmem [resolvable:$true] %s204_s14 }
  0x17   : > { %s193_s16 = scalar_lea.sflag [#allocation3], %s970_s7  ;;  %s744_s17 = scalar_lea.hbm %s979_s12, 256 }
  0x18   : > { %p745_p2 = scmp.ne.s32.totalorder %s979_s12, %s744_s17  ;;  %p746_p3 = pneg %p985_p13 }
  0x19   : > { %s749_s26 = scalar_lea.hbm %s1152_s0, 512  ;;  %p750_p5 = scmp.lt.u32.totalorder %s979_s12, %s1152_s0 }
  0x1a   : > { %p747_p4 = pnand %p746_p3, %p745_p2  ;;  %p751_p8 = scmp.lt.u32.totalorder %s749_s26, %s744_s17 }
  0x1b   : > { %p753_p9 = scmp.lt.u32.totalorder %s744_s17, %s979_s12 }
  0x1c   : > { %p748_p7 = pneg %p747_p4  ;;  %p752_p10 = por %p751_p8, %p750_p5 }
  0x1e   : > { %p754_p0 = por %p753_p9, %p752_p10 }
  0x20   : > { %p755_p1 = pnand %p754_p0, %p748_p7 }
  0x22   : > { %758 = shalt.err (!%p755_p1)
}
  0x23   : > { %s759_s11 = scalar_lea.vmem %s989_s14, 256  ;;  %s876_s13 = smov [#allocation2]  }
  0x24   : > { %p760_p2 = scmp.ne.s32.totalorder %s989_s14, %s759_s11  ;;  %s764_s23 = sshll.u32 %s876_s13, 4  ;;  %s765_s23 = int_to_ptr.vmem [resolvable:$false] %s764_s23 }
  0x25   : > { %s766_s25 = scalar_lea.vmem %s765_s23, 512  ;;  %p767_p11 = scmp.lt.s32.totalorder %s989_s14, %s765_s23 }
  0x26   : > { %p762_p4 = pnand %p760_p2, %p746_p3  ;;  %p768_p5 = scmp.lt.s32.totalorder %s766_s25, %s759_s11 }
  0x28   : > { %p763_p12 = pneg %p762_p4  ;;  %p769_p8 = por %p768_p5, %p767_p11 }
  0x2a   : > { %p770_p9 = pnand %p769_p8, %p763_p12 }
  0x2c   : > { %773 = shalt.err (!%p770_p9)
}
  0x2d   : > { %685 = dma.hbm_to_vmem [thread:$0]  (!%p985_p13), %s979_s12, 256, %s989_s14, %s193_s16  }
  0x2e   : > { %p1165_p0 = scmp.lt.s32.totalorder %s874_s21, 3  ;;  %p1166_p1 = scmp.ge.s32.totalorder %s874_s21, 1 }
  0x2f   : > { %s1032_s10 = scalar_lea.hbm %s1153_s1, %s673_s8  ;;  %s215_s11 = scalar_lea.vmem [#allocation5], %s654_s9 }
  0x30   : > { %p1023_p7 = pnand %p1166_p1, %p1165_p0  ;;  %s223_s13 = sshll.u32 %s215_s11, 4  ;;  %s224_s13 = int_to_ptr.vmem [resolvable:$true] %s223_s13 }
  0x31   : > { %s212_s12 = scalar_lea.sflag [#allocation6], %s970_s7  ;;  %s774_s14 = scalar_lea.hbm %s1032_s10, 256 }
  0x32   : > { %s1167_s17 = scalar_select %p1023_p7, 1, 0 }
  0x33   : > { %p775_p11 = scmp.ne.s32.totalorder %s1032_s10, %s774_s14  ;;  %s779_s8 = scalar_lea.hbm %s1153_s1, 512 }
  0x34   : > { %p780_p2 = scmp.lt.u32.totalorder %s1032_s10, %s1153_s1  ;;  %p781_p4 = scmp.lt.u32.totalorder %s779_s8, %s774_s14 }
  0x35   : > { %p777_p12 = pnand %p775_p11, %p746_p3  ;;  %p783_p8 = scmp.lt.u32.totalorder %s774_s14, %s1032_s10 }
  0x36   : > { %p782_p5 = por %p781_p4, %p780_p2 }
  0x37   : > { %p778_p10 = pneg %p777_p12 }
  0x38   : > { %p784_p9 = por %p783_p8, %p782_p5 }
  0x3a   : > { %p785_p0 = pnand %p784_p9, %p778_p10 }
  0x3c   : > { %788 = shalt.err (!%p785_p0)
}
  0x3d   : > { %s789_s7 = scalar_lea.vmem %s224_s13, 256  ;;  %s877_s9 = smov [#allocation5]  }
  0x3e   : > { %p790_p1 = scmp.ne.s32.totalorder %s224_s13, %s789_s7  ;;  %s794_s28 = sshll.u32 %s877_s9, 4  ;;  %s795_s28 = int_to_ptr.vmem [resolvable:$false] %s794_s28 }
  0x3f   : > { %s796_s11 = scalar_lea.vmem %s795_s28, 512  ;;  %p797_p6 = scmp.lt.s32.totalorder %s224_s13, %s795_s28 }
  0x40   : > { %p792_p11 = pnand %p790_p1, %p746_p3  ;;  %p798_p7 = scmp.lt.s32.totalorder %s796_s11, %s789_s7 }
  0x42   : > { %p793_p12 = pneg %p792_p11  ;;  %p799_p2 = por %p798_p7, %p797_p6 }
  0x44   : > { %p800_p4 = pnand %p799_p2, %p793_p12 }
  0x46   : > { %803 = shalt.err (!%p800_p4)
}
  0x47   : > { %688 = dma.hbm_to_vmem [thread:$0]  (!%p985_p13), %s1032_s10, 256, %s224_s13, %s212_s12  }
  0x48   : > { %p1168_p10 = scmp.ne.s32.totalorder %s1167_s17, 0 }
  0x49   : > { %s1059_s14 = sand.u32 (!%p1168_p10), 1, %s866_s19   ;;  %p1169_p6 = scmp.ne.s32.totalorder (!%p1168_p10), %s1161_s29, 0 }
  0x4a   : > { %232 = sbr.rel (%p1168_p10) target bundleno = 704 (0x2c0), region = 40  ;;  %s1062_s16 = sshll.u32 (!%p1168_p10), %s1059_s14, 4 }
  0x4b   : > { %s235_s23 = scalar_lea.sflag (!%p1168_p10), [#allocation3], %s1059_s14  ;;  %s238_s8 = scalar_lea.vmem (!%p1168_p10), [#allocation2], %s1062_s16 }
  0x51   : > { %849 = dma.done.wait (%p1169_p6), %s235_s23, 256  }
  0x52   : > { %851 = vsyncadd (%p1169_p6), %s235_s23, 4294967040  ;;  %s244_s15 = scalar_lea.sflag [#allocation6], %s1059_s14  ;;  %s247_s17 = scalar_lea.vmem [#allocation5], %s1062_s16 }
  0x53   : > { %853 = dma.done.wait (%p1169_p6), %s244_s15, 256  }
  0x54   : > { %855 = vsyncadd (%p1169_p6), %s244_s15, 4294967040  ;;  %v878_v0 = vmov 0.0   ;;  %v280_v1 = vld [vmem:[%s238_s8 + $0x8] sm:$0xff]  ;;  %v279_v2 = vld [vmem:[%s238_s8] sm:$0xff]  ;;  %vm284_vm0 = vcmask 64512   ;;  %v879_v7 = vmov 0  }
  0x55   : > { %352 = vmatprep.mubr.f32.mxu0 %v878_v0  ;;  %452 = vmatprep.mubr.f32.mxu1 %v878_v0  ;;  %v283_v3 = vld [vmem:[%s1154_s2] sm:$0xf]  ;;  %v1079_v4 = vld [vmem:[%s247_s17 + $0x8] sm:$0xff]  ;;  %vm359_vm1 = vcmask 1043456   ;;  %s675_s7 = sshll.u32 %s932_s22, 8  ;;  %s278_s9 = scalar_lea.vmem [#allocation7], %s1062_s16 }
  0x56   : > { %288 = vmatprep.subr.mxu0 %v280_v1  ;;  %v1081_v5 = vld [vmem:[%s247_s17] sm:$0xff]  ;;  %388 = vmatprep.subr.mxu1 %v1079_v4  ;;  %s558_s28 = sshll.u32 %s278_s9, 4  ;;  %s1108_s8 = scalar_lea.hbm %s1157_s5, %s675_s7  ;;  %s1110_s28 = int_to_ptr.vmem [resolvable:$true] %s558_s28 }
  0x57   : > { %v384_v6 = vld [vmem:[%s1155_s3] sm:$0xf]  ;;  %289 = vmatpush1.msra.mxu0 %v279_v2  ;;  %389 = vmatpush1.msra.mxu1 %v1081_v5  ;;  %s544_s22 = scalar_lea.sflag [#allocation4], %s1059_s14  ;;  %s804_s16 = scalar_lea.vmem %s1110_s28, 256 }
  0x58   : > { %664 = vmatmul.mubr.msk.f32.vlgmr.msra.gmra.mrb[0].mxu0 %vm284_vm0, %v283_v3  ;;  %665 = vmatmul.mubr.msk.f32.vlgmr.msra.gmra.mrb[0].mxu1 %vm284_vm0, %v384_v6  ;;  %v486_v28 = vld [vmem:[%s1156_s4] sm:$0xf]  ;;  %p805_p13 = scmp.ne.s32.totalorder %s1110_s28, %s804_s16  ;;  %p1170_p3 = scmp.ne.s32.totalorder %s1162_s30, 0 }
  0x59   : > { %729 = vset.pattern.permute.xlu0 %v879_v7  ;;  %s880_s15 = smov [#allocation7]  }
  0x5a   : > { %p806_p7 = pnand %p805_p13, %p1170_p3  ;;  %s808_s17 = sshll.u32 %s880_s15, 4  ;;  %s809_s17 = int_to_ptr.vmem [resolvable:$false] %s808_s17 }
  0x5b   : > { %s810_s10 = scalar_lea.vmem %s809_s17, 512  ;;  %p811_p8 = scmp.lt.s32.totalorder %s1110_s28, %s809_s17 }
  0x5c   : > { %p807_p5 = pneg %p806_p7  ;;  %p812_p9 = scmp.lt.s32.totalorder %s810_s10, %s804_s16 }
  0x5e   : > { %p813_p0 = por %p812_p9, %p811_p8 }
  0x60   : > { %p814_p1 = pnand %p813_p0, %p807_p5 }
 0x12b   : > { %v354_v8 = vpop.f32.mrb[0].mxu0  ;;  %v454_v10 = vpop.f32.mrb[0].mxu1 }
 0x12c   : > { %v356_v9 = vpop.f32.mrb[1].mxu0  ;;  %v360_v11 = vsel %vm359_vm1, %v354_v8, 0.0  ;;  %v367_v12 = vmul.f32 %v354_v8, %v354_v8  ;;  %v465_v14 = vmul.f32 %v454_v10, %v454_v10  ;;  %v456_v15 = vpop.f32.mrb[1].mxu1  ;;  %v459_v17 = vsel %vm359_vm1, %v454_v10, 0.0 }
 0x12d   : > { %v368_v13 = vmul.f32 %v356_v9, %v356_v9  ;;  %v361_v16 = vsel %vm359_vm1, %v356_v9, 0.0  ;;  %v460_v18 = vsel %vm359_vm1, %v456_v15, 0.0  ;;  %v466_v19 = vmul.f32 %v456_v15, %v456_v15 }
 0x12e   : > { %v362_v20 = vadd.f32 %v361_v16, %v360_v11  ;;  %v369_v21 = vsel %vm359_vm1, %v367_v12, 0.0  ;;  %v461_v23 = vadd.f32 %v460_v18, %v459_v17  ;;  %v467_v24 = vsel %vm359_vm1, %v465_v14, 0.0 }
 0x12f   : > { %v370_v22 = vsel %vm359_vm1, %v368_v13, 0.0  ;;  %v468_v26 = vsel %vm359_vm1, %v466_v19, 0.0 }
 0x130   : > { %363 = vadd.xlane.f32.xlu0 %v362_v20  ;;  %v371_v25 = vadd.f32 %v370_v22, %v369_v21  ;;  %v469_v27 = vadd.f32 %v468_v26, %v467_v24 }
 0x132   : > { %372 = vadd.xlane.f32.xlu1 %v371_v25 }
 0x134   : > { %462 = vadd.xlane.f32.xlu0 %v461_v23 }
 0x136   : > { %470 = vadd.xlane.f32.xlu1 %v469_v27 }
 0x14a   : > { %489 = vperm.xlu0 %729, %v486_v28  }
 0x1bd   : > { %v364_v29 = vpop.xlane.xlu0 %363 }
 0x1be   : > { %v366_v30 = vmul.f32 0.00390625, %v364_v29 }
 0x1bf   : > { %v373_v31 = vpop.xlane.xlu1 %372 }
 0x1c0   : > { %v374_v32 = vmul.f32 0.00390625, %v373_v31  ;;  %v375_v33 = vmul.f32 %v366_v30, %v366_v30  ;;  %v378_v46 = vsub.f32 %v354_v8, %v366_v30  ;;  %v379_v47 = vsub.f32 %v356_v9, %v366_v30 }
 0x1c1   : > { %v463_v34 = vpop.xlane.xlu0 %462 }
 0x1c2   : > { %v376_v35 = vsub.f32 %v374_v32, %v375_v33  ;;  %v464_v36 = vmul.f32 0.00390625, %v463_v34 }
 0x1c3   : > { %v471_v37 = vpop.xlane.xlu1 %470 }
 0x1c4   : > { %v377_v38 = vmax.f32 %v376_v35, 0.0  ;;  %v472_v39 = vmul.f32 0.00390625, %v471_v37  ;;  %v473_v40 = vmul.f32 %v464_v36, %v464_v36  ;;  %v476_v48 = vsub.f32 %v454_v10, %v464_v36 }
 0x1c5   : > { %v477_v49 = vsub.f32 %v456_v15, %v464_v36 }
 0x1c6   : > { %v380_v41 = vadd.f32 1e-05, %v377_v38  ;;  %v474_v42 = vsub.f32 %v472_v39, %v473_v40 }
 0x1c8   : > { %v475_v43 = vmax.f32 %v474_v42, 0.0  ;;  %730 = vrsqrt.f32 %v380_v41 }
 0x1c9   : > { %v490_v57 = vpop.permute.xlu0 %489 }
 0x1ca   : > { %v478_v44 = vadd.f32 1e-05, %v475_v43 }
 0x1cc   : > { %732 = vrsqrt.f32 %v478_v44 }
 0x1d2   : > { %v731_v45 = vpop.eup %730 }
 0x1d3   : > { %v382_v51 = vmul.f32 %v731_v45, %v378_v46  ;;  %v383_v52 = vmul.f32 %v731_v45, %v379_v47 }
 0x1d6   : > { %v733_v50 = vpop.eup %732 }
 0x1d7   : > { %v480_v53 = vmul.f32 %v733_v50, %v476_v48  ;;  %v481_v54 = vmul.f32 %v733_v50, %v477_v49 }
 0x1d9   : > { %v482_v55 = vadd.f32 %v480_v53, %v382_v51  ;;  %v483_v56 = vadd.f32 %v481_v54, %v383_v52 }
 0x1db   : > { %v484_v58 = vmax.f32 %v482_v55, 0.0  ;;  %v485_v59 = vmax.f32 %v483_v56, 0.0 }
 0x1dd   : > { %v492_v60 = vmul.f32 %v490_v57, %v484_v58  ;;  %v493_v61 = vmul.f32 %v490_v57, %v485_v59 }
 0x1df   : > { %v494_v62 = vsel %vm359_vm1, %v492_v60, 0.0  ;;  %v501_v63 = vsel %vm359_vm1, %v493_v61, 0.0 }
 0x1e0   : > { %v495_v0 = vrot.slane %v494_v62, 4  ;;  %v502_v1 = vrot.slane %v501_v63, 4 }
 0x1e2   : > { %v496_v2 = vadd.f32 %v495_v0, %v494_v62  ;;  %v503_v3 = vadd.f32 %v502_v1, %v501_v63 }
 0x1e4   : > { %v497_v6 = vrot.slane %v496_v2, 2  ;;  %v504_v7 = vrot.slane %v503_v3, 2 }
 0x1e6   : > { %v498_v8 = vadd.f32 %v497_v6, %v496_v2  ;;  %v505_v9 = vadd.f32 %v504_v7, %v503_v3 }
 0x1e8   : > { %v499_v10 = vrot.slane %v498_v8, 1  ;;  %v506_v11 = vrot.slane %v505_v9, 1 }
 0x1ea   : > { %v500_v12 = vadd.f32 %v499_v10, %v498_v8  ;;  %v507_v13 = vadd.f32 %v506_v11, %v505_v9 }
 0x1ec   : > { %v508_v14 = vadd.f32 %v507_v13, %v500_v12  ;;  %v512_v15 = vmul.f32 %v500_v12, %v500_v12  ;;  %v513_v16 = vmul.f32 %v507_v13, %v507_v13 }
 0x1ee   : > { %509 = vadd.xlane.f32.xlu1 %v508_v14  ;;  %v514_v17 = vadd.f32 %v513_v16, %v512_v15 }
 0x1f2   : > { %515 = vadd.xlane.f32.xlu1 %v514_v17 }
 0x27b   : > { %v510_v18 = vpop.xlane.xlu1 %509 }
 0x27c   : > { %v511_v19 = vmul.f32 0.00390625, %v510_v18 }
 0x27e   : > { %v518_v21 = vmul.f32 %v511_v19, %v511_v19  ;;  %v521_v26 = vsub.f32 %v500_v12, %v511_v19  ;;  %v522_v27 = vsub.f32 %v507_v13, %v511_v19 }
 0x27f   : > { %v516_v20 = vpop.xlane.xlu1 %515 }
 0x280   : > { %v517_v22 = vmul.f32 0.00390625, %v516_v20 }
 0x282   : > { %v519_v23 = vsub.f32 %v517_v22, %v518_v21 }
 0x284   : > { %v520_v24 = vmax.f32 %v519_v23, 0.0 }
 0x286   : > { %v523_v25 = vadd.f32 1e-05, %v520_v24 }
 0x288   : > { %734 = vrsqrt.f32 %v523_v25 }
 0x292   : > { %v735_v28 = vpop.eup %734 }
 0x293   : > { %v525_v29 = vmul.f32 %v735_v28, %v521_v26  ;;  %v526_v30 = vmul.f32 %v735_v28, %v522_v27 }
 0x295   : > { %v666_v31 = vmul.f32 -1.442695, %v525_v29  ;;  %v667_v32 = vmul.f32 -1.442695, %v526_v30 }
 0x297   : > { %736 = vpow2.f32 %v666_v31 }
 0x298   : > { %738 = vpow2.f32 %v667_v32 }
 0x2a1   : > { %v737_v33 = vpop.eup %736 }
 0x2a2   : > { %v739_v34 = vpop.eup %738  ;;  %v533_v35 = vadd.f32 1.0, %v737_v33 }
 0x2a3   : > { %v534_v36 = vadd.f32 1.0, %v739_v34 }
 0x2a4   : > { %740 = vrcp.f32 %v533_v35 }
 0x2a5   : > { %742 = vrcp.f32 %v534_v36 }
 0x2ae   : > { %v741_v37 = vpop.eup %740 }
 0x2af   : > { %v743_v38 = vpop.eup %742  ;;  %v539_v39 = vmul.f32 %v741_v37, %v1081_v5 }
 0x2b0   : > { %v540_v40 = vmul.f32 %v743_v38, %v1079_v4 }
 0x2b1   : > { %541 = vst [vmem:[%s278_s9] sm:$0xff] %v539_v39 }
 0x2b2   : > { %542 = vst [vmem:[%s278_s9 + $0x8] sm:$0xff] %v540_v40 }
 0x2b3   : > { %817 = shalt.err (!%p814_p1)
}
 0x2b4   : > { %s818_s14 = scalar_lea.hbm %s1108_s8, 256  ;;  %s822_s25 = scalar_lea.hbm %s1157_s5, 512 }
 0x2b5   : > { %p819_p11 = scmp.ne.s32.totalorder %s1108_s8, %s818_s14  ;;  %p823_p4 = scmp.lt.u32.totalorder %s1108_s8, %s1157_s5 }
 0x2b6   : > { %p824_p10 = scmp.lt.u32.totalorder %s822_s25, %s818_s14  ;;  %p826_p13 = scmp.lt.u32.totalorder %s818_s14, %s1108_s8 }
 0x2b7   : > { %p820_p12 = pnand %p819_p11, %p1170_p3 }
 0x2b8   : > { %p825_p6 = por %p824_p10, %p823_p4 }
 0x2b9   : > { %p821_p2 = pneg %p820_p12 }
 0x2ba   : > { %p827_p7 = por %p826_p13, %p825_p6 }
 0x2bc   : > { %p828_p5 = pnand %p827_p7, %p821_p2 }
 0x2be   : > { %831 = shalt.err (!%p828_p5)
}
 0x2bf   : > { %680 = dma.vmem_to_hbm [thread:$0]  (%p1170_p3), %s1110_s28, 256, %s1108_s8, %s544_s22  }
 0x2c0 PF: > { %s570_s7 = sand.u32 1, %s862_s18   ;;  %p1171_p8 = scmp.ne.s32.totalorder %s1163_s6, 0 }
 0x2c1   : > { %p1172_p9 = scmp.ge.s32.totalorder %s874_s21, 2  ;;  %s571_s9 = scalar_lea.sflag [#allocation4], %s570_s7 }
 0x2c3   : > { %p690_p0 = pnand %p1172_p9, %p1171_p8 }
 0x2c5   : > { %857 = dma.done.wait (!%p690_p0), %s571_s9, 256  }
 0x2c6   : > { %859 = vsyncadd (!%p690_p0), %s571_s9, 4294967040  ;;  %p21_p1 = scmp.ge.s32.totalorder %s936_s24, 4   ;;  %s1173_s18 = smov %s866_s19 }
 0x2c7   : > { %s1174_s19 = smov %s870_s20  ;;  %s1175_s20 = smov %s948_s27 }
 0x2c8   : > { %s1176_s21 = smov %s936_s24  ;;  %23 = sbr.rel (!%p21_p1) target bundleno = 7 (0x7), region = 98 }
 0x2cf   :  { %576 = vsyncpa [#allocation3], 1 }
 0x2d0   :  { %578 = vsyncpa [#allocation3 + $0x1], 1 }
 0x2d1   :  { %579 = vsyncpa [#allocation6], 1 }
 0x2d2   :  { %581 = vsyncpa [#allocation6 + $0x1], 1 }
 0x2d3   :  { %582 = vsyncpa [#allocation4], 1 }
 0x2d4   :  { %584 = vsyncpa [#allocation4 + $0x1], 1 }

</bundles_post_ra>
